<compile_context>
chip_gen: v5e
topology: v5e:2x2
jax: 0.10.0
libtpu: 0.0.40
codegen_flags: <defaults>
</compile_context>

<pallas_src>
import jax
import jax.numpy as jnp
from jax.experimental import pallas as pl
from jax.experimental.pallas import tpu as pltpu

LANE = 128
ROW_ALIGN = 16  # bf16 packs 16 rows per sublane group


def _round_up(x, m):
    return ((x + m - 1) // m) * m


def decoder_answer_kernel(x_ref, w1_ref, b1_ref, w2_ref, b2_ref, w3_ref, b3_ref, o_ref):
    # x_ref: (tile_r, L) f32; weights (in, out) bf16; biases (1, out) f32.
    x = x_ref[...].astype(jnp.bfloat16)                      # cast fused in-kernel
    h1 = jnp.dot(x, w1_ref[...], preferred_element_type=jnp.float32) + b1_ref[...]
    h1 = jnp.maximum(h1, 0.0).astype(jnp.bfloat16)
    h2 = jnp.dot(h1, w2_ref[...], preferred_element_type=jnp.float32) + b2_ref[...]
    h2 = jnp.maximum(h2, 0.0).astype(jnp.bfloat16)
    h3 = jnp.dot(h2, w3_ref[...], preferred_element_type=jnp.float32) + b3_ref[...]
    o_ref[...] = jnp.maximum(h3, 0.0).astype(o_ref.dtype)


def prepare_padded_params(params):
    """Pad ONLY the hidden dim up to a multiple of 128 and cast weights to bf16.

    Padded hidden weight columns/rows and bias entries are zero; ReLU(0)=0, so
    the padded hidden channels stay 0 through every layer (inert padding).
    The latent (x) and embed (output) dims are left at their natural sizes so
    no extra HBM bytes are read/written for x or the output.
    """
    w1, b1, w2, b2, w3, b3 = params
    L, H = w1.shape
    E = w3.shape[1]
    Hp = _round_up(H, LANE)

    def pad_w(w, rp, cp):
        return jnp.pad(w, ((0, rp - w.shape[0]), (0, cp - w.shape[1]))).astype(jnp.bfloat16)

    def pad_b(b, cp):
        return jnp.pad(b, ((0, 0), (0, cp - b.shape[1]))).astype(jnp.float32)

    return (pad_w(w1, L, Hp), pad_b(b1, Hp),
            pad_w(w2, Hp, Hp), pad_b(b2, Hp),
            pad_w(w3, Hp, E), pad_b(b3, E))


def _vmem_capacity_bytes():
    try:
        return int(pltpu.get_tpu_info().vmem_capacity_bytes)
    except Exception:
        return 64 << 20  # conservative: v7x per-TensorCore VMEM


def _select_tile_r(R, L, Hp, E, out_itemsize, vmem_cap, requested):
    """Row-tile size: big enough to amortize per-step overhead, small enough to
    fit (weights + double-buffered x/out tiles + in-kernel intermediates) in
    VMEM, multiple of 16, and leaving >=2 grid steps when R allows it."""
    weight_bytes = (L * Hp + Hp * Hp + Hp * E) * 2 + (2 * Hp + E) * 4
    per_row = (2 * L * 4 + 2 * E * out_itemsize        # double-buffered x / out tiles
               + Hp * (4 + 2) * 2 + E * 4)             # h1,h2 (f32 + bf16 copy), h3 f32
    budget = (vmem_cap * 4) // 5 - weight_bytes - (4 << 20)
    fit = max(ROW_ALIGN, (max(budget, 0) // max(per_row, 1)) // ROW_ALIGN * ROW_ALIGN)

    tile = requested if requested is not None else 2048   # amortize ~0.35us/step
    tile = min(tile, fit)
    if R > ROW_ALIGN:
        # keep >= 2 grid steps so v7x can shard rows across both TensorCores
        tile = min(tile, _round_up((R + 1) // 2, ROW_ALIGN))
    tile = max(ROW_ALIGN, min(tile, _round_up(R, ROW_ALIGN)))
    return _round_up(tile, ROW_ALIGN)


def _build_pallas_call(tile_r, grid, L, Hp, E, out_dtype, vmem_limit, cost,
                       single_buffer_weights):
    # Constant-index weight/bias operands: single-buffer them (double buffering
    # buys nothing when the block never changes) to halve resident-weight VMEM.
    resident = {"pipeline_mode": pl.Buffered(1)} if single_buffer_weights else {}
    in_specs = [
        pl.BlockSpec((tile_r, L), lambda i: (i, 0)),               # x: streamed row tiles
        pl.BlockSpec((L, Hp), lambda i: (0, 0), **resident),       # w1 (VMEM-resident)
        pl.BlockSpec((1, Hp), lambda i: (0, 0), **resident),       # b1
        pl.BlockSpec((Hp, Hp), lambda i: (0, 0), **resident),      # w2
        pl.BlockSpec((1, Hp), lambda i: (0, 0), **resident),       # b2
        pl.BlockSpec((Hp, E), lambda i: (0, 0), **resident),       # w3
        pl.BlockSpec((1, E), lambda i: (0, 0), **resident),        # b3
    ]
    return pl.pallas_call(
        decoder_answer_kernel,
        out_shape=jax.ShapeDtypeStruct((grid[0] * tile_r, E), out_dtype),
        grid=grid,
        in_specs=in_specs,
        out_specs=pl.BlockSpec((tile_r, E), lambda i: (i, 0)),
        compiler_params=pltpu.CompilerParams(
            dimension_semantics=("parallel",),
            vmem_limit_bytes=vmem_limit),
        cost_estimate=cost,
    )


def decoder_answer_forward(x, padded_params, embed_dim, latent_dim, *,
                           tile_r=None, out_dtype=jnp.float32):
    """x: (batch, seq, latent_dim) f32 -> (batch, seq, embed_dim) out_dtype."""
    w1, b1, w2, b2, w3, b3 = padded_params
    L, Hp = w1.shape
    E = w3.shape[1]
    B, S, Lx = x.shape
    assert Lx == latent_dim == L and E == embed_dim
    R = B * S

    out_sz = jnp.dtype(out_dtype).itemsize
    vmem_cap = _vmem_capacity_bytes()
    tile_r = _select_tile_r(R, L, Hp, E, out_sz, vmem_cap, tile_r)
    Rp = _round_up(R, tile_r)
    grid = (Rp // tile_r,)

    # x stays f32 and un-padded on the feature axis (reshape is metadata-only);
    # only pad rows when tile_r does not divide R.
    x2d = x.reshape(R, L)
    if Rp > R:
        x2d = jnp.pad(x2d, ((0, Rp - R), (0, 0)))

    # Advisory cost estimate for the XLA scheduler.
    flops = 2 * Rp * (L * Hp + Hp * Hp + Hp * E)
    bytes_accessed = (Rp * L * 4
                      + (w1.size + w2.size + w3.size) * 2
                      + (b1.size + b2.size + b3.size) * 4
                      + Rp * E * out_sz)
    cost = pl.CostEstimate(flops=flops, transcendentals=0,
                           bytes_accessed=bytes_accessed)

    # VMEM budget: single-buffered weights + double-buffered x/out tiles
    # + in-kernel intermediates; never exceed ~90% of physical VMEM.
    weight_bytes = (w1.size + w2.size + w3.size) * 2 + (b1.size + b2.size + b3.size) * 4
    vmem_bytes = (2 * tile_r * L * 4
                  + 2 * tile_r * E * out_sz
                  + weight_bytes
                  + tile_r * (Hp * (4 + 2) * 2 + E * 4))
    vmem_limit = int(min(max(2 * vmem_bytes + (4 << 20), 32 << 20),
                         (vmem_cap * 9) // 10))

    def run(single_buffer_weights):
        call = _build_pallas_call(tile_r, grid, L, Hp, E, out_dtype,
                                  vmem_limit, cost, single_buffer_weights)
        return call(x2d, w1, b1, w2, b2, w3, b3)

    try:
        out2d = run(True)
    except Exception:
        # Fallback: default (double) buffering if Buffered(1) is unsupported.
        out2d = run(False)

    if Rp > R:
        out2d = out2d[:R]
    return out2d.reshape(B, S, embed_dim)


def init_params(key, embed_dim, latent_dim):
    """Deterministic PyTorch-style (uniform +-1/sqrt(fan_in)) initialization.
    Weights are stored as (in_features, out_features) — i.e. already W^T — so
    the kernel computes x @ W + b, matching nn.Linear's x @ W.T + b."""
    hidden_dim = embed_dim // 2

    def linear(k, fan_in, fan_out):
        kw, kb = jax.random.split(k)
        bound = 1.0 / (fan_in ** 0.5)
        w = jax.random.uniform(kw, (fan_in, fan_out), jnp.float32, -bound, bound)
        b = jax.random.uniform(kb, (1, fan_out), jnp.float32, -bound, bound)
        return w, b

    k1, k2, k3 = jax.random.split(key, 3)
    w1, b1 = linear(k1, latent_dim, hidden_dim)   # lin1
    w2, b2 = linear(k2, hidden_dim, hidden_dim)   # lin2
    w3, b3 = linear(k3, hidden_dim, embed_dim)    # lin3
    return (w1, b1, w2, b2, w3, b3)


if __name__ == "__main__":
    embed_dim = 32     # nc
    latent_dim = 16
    seq_size = 8       # stored on the module; forward itself is shape-agnostic
    batch = 2

    key = jax.random.PRNGKey(0)
    kx, kp = jax.random.split(key)
    x = jax.random.normal(kx, (batch, seq_size, latent_dim), dtype=jnp.float32)
    params = init_params(kp, embed_dim, latent_dim)
    padded_params = prepare_padded_params(params)

    out = decoder_answer_forward(x, padded_params, embed_dim, latent_dim)
    out = jax.block_until_ready(out)

    # --- references ---
    w1, b1, w2, b2, w3, b3 = params
    x2d = x.reshape(-1, latent_dim)

    # (a) bf16-operand / f32-accumulate reference (matches kernel numerics)
    hb = jnp.maximum(jnp.dot(x2d.astype(jnp.bfloat16), w1.astype(jnp.bfloat16),
                             preferred_element_type=jnp.float32) + b1, 0.0)
    hb = jnp.maximum(jnp.dot(hb.astype(jnp.bfloat16), w2.astype(jnp.bfloat16),
                             preferred_element_type=jnp.float32) + b2, 0.0)
    hb = jnp.maximum(jnp.dot(hb.astype(jnp.bfloat16), w3.astype(jnp.bfloat16),
                             preferred_element_type=jnp.float32) + b3, 0.0)
    ref_bf16 = hb.reshape(batch, seq_size, embed_dim)

    # (b) pure-f32 reference (PyTorch-equivalent math)
    hf = jnp.maximum(x2d @ w1 + b1, 0.0)
    hf = jnp.maximum(hf @ w2 + b2, 0.0)
    ref_f32 = jnp.maximum(hf @ w3 + b3, 0.0).reshape(batch, seq_size, embed_dim)

    assert out.shape == (batch, seq_size, embed_dim)
    assert jnp.allclose(out, ref_bf16, atol=2e-3, rtol=2e-3)
    assert jnp.allclose(out, ref_f32, atol=5e-2, rtol=5e-2)

    print("KERNEL_OK")
</pallas_src>

<mosaic_0001>
module attributes {stable_mosaic.version = 11 : i64} {
  func.func @decoder_answer_kernel(%arg0: i32, %arg1: memref<16x16xf32, #tpu.memory_space<vmem>>, %arg2: memref<16x128xbf16, #tpu.memory_space<vmem>>, %arg3: memref<1x128xf32, #tpu.memory_space<vmem>>, %arg4: memref<128x128xbf16, #tpu.memory_space<vmem>>, %arg5: memref<1x128xf32, #tpu.memory_space<vmem>>, %arg6: memref<128x32xbf16, #tpu.memory_space<vmem>>, %arg7: memref<1x32xf32, #tpu.memory_space<vmem>>, %arg8: memref<16x32xf32, #tpu.memory_space<vmem>>) attributes {dimension_semantics = [#tpu.dimension_semantics<parallel>], iteration_bounds = array<i64: 1>, scalar_prefetch = 0 : i64, scratch_operands = 0 : i64, tpu.core_type = #tpu.core_type<tc>, window_params = [{transform_indices = @transform_0, window_bounds = array<i64: 16, 16>}, {pipeline_mode = #tpu.pipeline_mode<synchronous>, transform_indices = @transform_1, window_bounds = array<i64: 16, 128>}, {pipeline_mode = #tpu.pipeline_mode<synchronous>, transform_indices = @transform_2, window_bounds = array<i64: 1, 128>}, {pipeline_mode = #tpu.pipeline_mode<synchronous>, transform_indices = @transform_3, window_bounds = array<i64: 128, 128>}, {pipeline_mode = #tpu.pipeline_mode<synchronous>, transform_indices = @transform_4, window_bounds = array<i64: 1, 128>}, {pipeline_mode = #tpu.pipeline_mode<synchronous>, transform_indices = @transform_5, window_bounds = array<i64: 128, 32>}, {pipeline_mode = #tpu.pipeline_mode<synchronous>, transform_indices = @transform_6, window_bounds = array<i64: 1, 32>}, {transform_indices = @transform_7, window_bounds = array<i64: 16, 32>}]} {
    %c0 = arith.constant 0 : index
    %c0_0 = arith.constant 0 : index
    %0 = vector.load %arg1[%c0, %c0_0] : memref<16x16xf32, #tpu.memory_space<vmem>>, vector<16x16xf32>
    %1 = arith.truncf %0 : vector<16x16xf32> to vector<16x16xbf16>
    %c0_1 = arith.constant 0 : index
    %c0_2 = arith.constant 0 : index
    %2 = vector.load %arg2[%c0_1, %c0_2] : memref<16x128xbf16, #tpu.memory_space<vmem>>, vector<16x128xbf16>
    %cst = arith.constant dense<0.000000e+00> : vector<16x128xf32>
    %3 = tpu.matmul %1, %2, %cst {dimension_numbers = #tpu.dot_dimension_numbers<[1], [0], [0], [1], [0, 0, 1, 1], [], []>} : vector<16x16xbf16>, vector<16x128xbf16>, vector<16x128xf32> -> vector<16x128xf32>
    %c0_3 = arith.constant 0 : index
    %c0_4 = arith.constant 0 : index
    %4 = vector.load %arg3[%c0_3, %c0_4] : memref<1x128xf32, #tpu.memory_space<vmem>>, vector<1x128xf32>
    %5 = vector.broadcast %4 : vector<1x128xf32> to vector<16x128xf32>
    %6 = arith.addf %3, %5 : vector<16x128xf32>
    %cst_5 = arith.constant 0.000000e+00 : f32
    %7 = vector.broadcast %cst_5 : f32 to vector<16x128xf32>
    %8 = arith.maximumf %6, %7 : vector<16x128xf32>
    %9 = arith.truncf %8 : vector<16x128xf32> to vector<16x128xbf16>
    %c0_6 = arith.constant 0 : index
    %c0_7 = arith.constant 0 : index
    %10 = vector.load %arg4[%c0_6, %c0_7] : memref<128x128xbf16, #tpu.memory_space<vmem>>, vector<128x128xbf16>
    %cst_8 = arith.constant dense<0.000000e+00> : vector<16x128xf32>
    %11 = tpu.matmul %9, %10, %cst_8 {dimension_numbers = #tpu.dot_dimension_numbers<[1], [0], [0], [1], [0, 0, 1, 1], [], []>} : vector<16x128xbf16>, vector<128x128xbf16>, vector<16x128xf32> -> vector<16x128xf32>
    %c0_9 = arith.constant 0 : index
    %c0_10 = arith.constant 0 : index
    %12 = vector.load %arg5[%c0_9, %c0_10] : memref<1x128xf32, #tpu.memory_space<vmem>>, vector<1x128xf32>
    %13 = vector.broadcast %12 : vector<1x128xf32> to vector<16x128xf32>
    %14 = arith.addf %11, %13 : vector<16x128xf32>
    %cst_11 = arith.constant 0.000000e+00 : f32
    %15 = vector.broadcast %cst_11 : f32 to vector<16x128xf32>
    %16 = arith.maximumf %14, %15 : vector<16x128xf32>
    %17 = arith.truncf %16 : vector<16x128xf32> to vector<16x128xbf16>
    %c0_12 = arith.constant 0 : index
    %c0_13 = arith.constant 0 : index
    %18 = vector.load %arg6[%c0_12, %c0_13] : memref<128x32xbf16, #tpu.memory_space<vmem>>, vector<128x32xbf16>
    %cst_14 = arith.constant dense<0.000000e+00> : vector<16x32xf32>
    %19 = tpu.matmul %17, %18, %cst_14 {dimension_numbers = #tpu.dot_dimension_numbers<[1], [0], [0], [1], [0, 0, 1, 1], [], []>} : vector<16x128xbf16>, vector<128x32xbf16>, vector<16x32xf32> -> vector<16x32xf32>
    %c0_15 = arith.constant 0 : index
    %c0_16 = arith.constant 0 : index
    %20 = vector.load %arg7[%c0_15, %c0_16] : memref<1x32xf32, #tpu.memory_space<vmem>>, vector<1x32xf32>
    %21 = vector.broadcast %20 : vector<1x32xf32> to vector<16x32xf32>
    %22 = arith.addf %19, %21 : vector<16x32xf32>
    %cst_17 = arith.constant 0.000000e+00 : f32
    %23 = vector.broadcast %cst_17 : f32 to vector<16x32xf32>
    %24 = arith.maximumf %22, %23 : vector<16x32xf32>
    %c0_18 = arith.constant 0 : index
    %c0_19 = arith.constant 0 : index
    %25 = vector.load %arg8[%c0_18, %c0_19] : memref<16x32xf32, #tpu.memory_space<vmem>>, vector<16x32xf32>
    tpu.vector_store %arg8[%c0_18, %c0_19], %24 {strides = array<i32>} : memref<16x32xf32, #tpu.memory_space<vmem>>, vector<16x32xf32>,
    return
  }
  func.func @transform_0(%arg0: i32) -> (i32, i32) {
    %c0_i32 = arith.constant 0 : i32
    %c0_i32_0 = arith.constant 0 : i32
    return %arg0, %c0_i32 : i32, i32
  }
  func.func @transform_1(%arg0: i32) -> (i32, i32) {
    %c0_i32 = arith.constant 0 : i32
    %c0_i32_0 = arith.constant 0 : i32
    %c0_i32_1 = arith.constant 0 : i32
    return %c0_i32, %c0_i32_0 : i32, i32
  }
  func.func @transform_2(%arg0: i32) -> (i32, i32) {
    %c0_i32 = arith.constant 0 : i32
    %c0_i32_0 = arith.constant 0 : i32
    %c0_i32_1 = arith.constant 0 : i32
    return %c0_i32, %c0_i32_0 : i32, i32
  }
  func.func @transform_3(%arg0: i32) -> (i32, i32) {
    %c0_i32 = arith.constant 0 : i32
    %c0_i32_0 = arith.constant 0 : i32
    %c0_i32_1 = arith.constant 0 : i32
    return %c0_i32, %c0_i32_0 : i32, i32
  }
  func.func @transform_4(%arg0: i32) -> (i32, i32) {
    %c0_i32 = arith.constant 0 : i32
    %c0_i32_0 = arith.constant 0 : i32
    %c0_i32_1 = arith.constant 0 : i32
    return %c0_i32, %c0_i32_0 : i32, i32
  }
  func.func @transform_5(%arg0: i32) -> (i32, i32) {
    %c0_i32 = arith.constant 0 : i32
    %c0_i32_0 = arith.constant 0 : i32
    %c0_i32_1 = arith.constant 0 : i32
    return %c0_i32, %c0_i32_0 : i32, i32
  }
  func.func @transform_6(%arg0: i32) -> (i32, i32) {
    %c0_i32 = arith.constant 0 : i32
    %c0_i32_0 = arith.constant 0 : i32
    %c0_i32_1 = arith.constant 0 : i32
    return %c0_i32, %c0_i32_0 : i32, i32
  }
  func.func @transform_7(%arg0: i32) -> (i32, i32) {
    %c0_i32 = arith.constant 0 : i32
    %c0_i32_0 = arith.constant 0 : i32
    return %arg0, %c0_i32 : i32, i32
  }
}

module attributes {stable_mosaic.version = 11 : i64} {
  func.func @decoder_answer_kernel(%arg0: i32, %arg1: memref<16x16xf32, #tpu.memory_space<vmem>>, %arg2: memref<16x128xbf16, #tpu.memory_space<vmem>>, %arg3: memref<1x128xf32, #tpu.memory_space<vmem>>, %arg4: memref<128x128xbf16, #tpu.memory_space<vmem>>, %arg5: memref<1x128xf32, #tpu.memory_space<vmem>>, %arg6: memref<128x32xbf16, #tpu.memory_space<vmem>>, %arg7: memref<1x32xf32, #tpu.memory_space<vmem>>, %arg8: memref<16x32xf32, #tpu.memory_space<vmem>>) attributes {dimension_semantics = [#tpu.dimension_semantics<parallel>], iteration_bounds = array<i64: 1>, scalar_prefetch = 0 : i64, scratch_operands = 0 : i64, tpu.core_type = #tpu.core_type<tc>, window_params = [{transform_indices = @transform_0, window_bounds = array<i64: 16, 16>}, {pipeline_mode = #tpu.pipeline_mode<synchronous>, transform_indices = @transform_1, window_bounds = array<i64: 16, 128>}, {pipeline_mode = #tpu.pipeline_mode<synchronous>, transform_indices = @transform_2, window_bounds = array<i64: 1, 128>}, {pipeline_mode = #tpu.pipeline_mode<synchronous>, transform_indices = @transform_3, window_bounds = array<i64: 128, 128>}, {pipeline_mode = #tpu.pipeline_mode<synchronous>, transform_indices = @transform_4, window_bounds = array<i64: 1, 128>}, {pipeline_mode = #tpu.pipeline_mode<synchronous>, transform_indices = @transform_5, window_bounds = array<i64: 128, 32>}, {pipeline_mode = #tpu.pipeline_mode<synchronous>, transform_indices = @transform_6, window_bounds = array<i64: 1, 32>}, {transform_indices = @transform_7, window_bounds = array<i64: 16, 32>}]} {
    %c0 = arith.constant 0 : index
    %c0_0 = arith.constant 0 : index
    %0 = vector.load %arg1[%c0, %c0_0] : memref<16x16xf32, #tpu.memory_space<vmem>>, vector<16x16xf32>
    %1 = arith.truncf %0 : vector<16x16xf32> to vector<16x16xbf16>
    %c0_1 = arith.constant 0 : index
    %c0_2 = arith.constant 0 : index
    %2 = vector.load %arg2[%c0_1, %c0_2] : memref<16x128xbf16, #tpu.memory_space<vmem>>, vector<16x128xbf16>
    %cst = arith.constant dense<0.000000e+00> : vector<16x128xf32>
    %3 = tpu.matmul %1, %2, %cst {dimension_numbers = #tpu.dot_dimension_numbers<[1], [0], [0], [1], [0, 0, 1, 1], [], []>} : vector<16x16xbf16>, vector<16x128xbf16>, vector<16x128xf32> -> vector<16x128xf32>
    %c0_3 = arith.constant 0 : index
    %c0_4 = arith.constant 0 : index
    %4 = vector.load %arg3[%c0_3, %c0_4] : memref<1x128xf32, #tpu.memory_space<vmem>>, vector<1x128xf32>
    %5 = vector.broadcast %4 : vector<1x128xf32> to vector<16x128xf32>
    %6 = arith.addf %3, %5 : vector<16x128xf32>
    %cst_5 = arith.constant 0.000000e+00 : f32
    %7 = vector.broadcast %cst_5 : f32 to vector<16x128xf32>
    %8 = arith.maximumf %6, %7 : vector<16x128xf32>
    %9 = arith.truncf %8 : vector<16x128xf32> to vector<16x128xbf16>
    %c0_6 = arith.constant 0 : index
    %c0_7 = arith.constant 0 : index
    %10 = vector.load %arg4[%c0_6, %c0_7] : memref<128x128xbf16, #tpu.memory_space<vmem>>, vector<128x128xbf16>
    %cst_8 = arith.constant dense<0.000000e+00> : vector<16x128xf32>
    %11 = tpu.matmul %9, %10, %cst_8 {dimension_numbers = #tpu.dot_dimension_numbers<[1], [0], [0], [1], [0, 0, 1, 1], [], []>} : vector<16x128xbf16>, vector<128x128xbf16>, vector<16x128xf32> -> vector<16x128xf32>
    %c0_9 = arith.constant 0 : index
    %c0_10 = arith.constant 0 : index
    %12 = vector.load %arg5[%c0_9, %c0_10] : memref<1x128xf32, #tpu.memory_space<vmem>>, vector<1x128xf32>
    %13 = vector.broadcast %12 : vector<1x128xf32> to vector<16x128xf32>
    %14 = arith.addf %11, %13 : vector<16x128xf32>
    %cst_11 = arith.constant 0.000000e+00 : f32
    %15 = vector.broadcast %cst_11 : f32 to vector<16x128xf32>
    %16 = arith.maximumf %14, %15 : vector<16x128xf32>
    %17 = arith.truncf %16 : vector<16x128xf32> to vector<16x128xbf16>
    %c0_12 = arith.constant 0 : index
    %c0_13 = arith.constant 0 : index
    %18 = vector.load %arg6[%c0_12, %c0_13] : memref<128x32xbf16, #tpu.memory_space<vmem>>, vector<128x32xbf16>
    %cst_14 = arith.constant dense<0.000000e+00> : vector<16x32xf32>
    %19 = tpu.matmul %17, %18, %cst_14 {dimension_numbers = #tpu.dot_dimension_numbers<[1], [0], [0], [1], [0, 0, 1, 1], [], []>} : vector<16x128xbf16>, vector<128x32xbf16>, vector<16x32xf32> -> vector<16x32xf32>
    %c0_15 = arith.constant 0 : index
    %c0_16 = arith.constant 0 : index
    %20 = vector.load %arg7[%c0_15, %c0_16] : memref<1x32xf32, #tpu.memory_space<vmem>>, vector<1x32xf32>
    %21 = vector.broadcast %20 : vector<1x32xf32> to vector<16x32xf32>
    %22 = arith.addf %19, %21 : vector<16x32xf32>
    %cst_17 = arith.constant 0.000000e+00 : f32
    %23 = vector.broadcast %cst_17 : f32 to vector<16x32xf32>
    %24 = arith.maximumf %22, %23 : vector<16x32xf32>
    %c0_18 = arith.constant 0 : index
    %c0_19 = arith.constant 0 : index
    %25 = vector.load %arg8[%c0_18, %c0_19] : memref<16x32xf32, #tpu.memory_space<vmem>>, vector<16x32xf32>
    tpu.vector_store %arg8[%c0_18, %c0_19], %24 {strides = array<i32>} : memref<16x32xf32, #tpu.memory_space<vmem>>, vector<16x32xf32>,
    return
  }
  func.func @transform_0(%arg0: i32) -> (i32, i32) {
    %c0_i32 = arith.constant 0 : i32
    %c0_i32_0 = arith.constant 0 : i32
    return %arg0, %c0_i32 : i32, i32
  }
  func.func @transform_1(%arg0: i32) -> (i32, i32) {
    %c0_i32 = arith.constant 0 : i32
    %c0_i32_0 = arith.constant 0 : i32
    %c0_i32_1 = arith.constant 0 : i32
    return %c0_i32, %c0_i32_0 : i32, i32
  }
  func.func @transform_2(%arg0: i32) -> (i32, i32) {
    %c0_i32 = arith.constant 0 : i32
    %c0_i32_0 = arith.constant 0 : i32
    %c0_i32_1 = arith.constant 0 : i32
    return %c0_i32, %c0_i32_0 : i32, i32
  }
  func.func @transform_3(%arg0: i32) -> (i32, i32) {
    %c0_i32 = arith.constant 0 : i32
    %c0_i32_0 = arith.constant 0 : i32
    %c0_i32_1 = arith.constant 0 : i32
    return %c0_i32, %c0_i32_0 : i32, i32
  }
  func.func @transform_4(%arg0: i32) -> (i32, i32) {
    %c0_i32 = arith.constant 0 : i32
    %c0_i32_0 = arith.constant 0 : i32
    %c0_i32_1 = arith.constant 0 : i32
    return %c0_i32, %c0_i32_0 : i32, i32
  }
  func.func @transform_5(%arg0: i32) -> (i32, i32) {
    %c0_i32 = arith.constant 0 : i32
    %c0_i32_0 = arith.constant 0 : i32
    %c0_i32_1 = arith.constant 0 : i32
    return %c0_i32, %c0_i32_0 : i32, i32
  }
  func.func @transform_6(%arg0: i32) -> (i32, i32) {
    %c0_i32 = arith.constant 0 : i32
    %c0_i32_0 = arith.constant 0 : i32
    %c0_i32_1 = arith.constant 0 : i32
    return %c0_i32, %c0_i32_0 : i32, i32
  }
  func.func @transform_7(%arg0: i32) -> (i32, i32) {
    %c0_i32 = arith.constant 0 : i32
    %c0_i32_0 = arith.constant 0 : i32
    return %arg0, %c0_i32 : i32, i32
  }
}

</mosaic_0001>

<bundles_post_ra>
// kernel: tpu_custom_call.1
= control target key start
LH: loop header
LB: loop body
LE: loop exit
PB: predicated region body
PF: predicated region fallthrough
CT: control target
= control target key end

     0   :  { %12 = vsyncpa [#allocation3], 0  ;;  %s533_s0 = inlined_call_operand.vmem [shape: f32[16,16], index: 0, kind: input, shape index: {}]   ;;  %s534_s1 = inlined_call_operand.hbm [shape: bf16[16,128], index: 1, kind: input, shape index: {}]   ;;  %s535_s2 = inlined_call_operand.vmem [shape: f32[1,128], index: 2, kind: input, shape index: {}]   ;;  %s536_s3 = inlined_call_operand.vmem [shape: bf16[128,128], index: 3, kind: input, shape index: {}]   ;;  %s537_s4 = inlined_call_operand.vmem [shape: f32[1,128], index: 4, kind: input, shape index: {}]   ;;  %s538_s5 = inlined_call_operand.vmem [shape: bf16[128,32], index: 5, kind: input, shape index: {}]   ;;  %s539_s6 = inlined_call_operand.vmem [shape: f32[1,32], index: 6, kind: input, shape index: {}]   ;;  %s540_s7 = inlined_call_operand.hbm [shape: f32[16,32], index: 7, kind: output, shape index: {}]  }
   0x1   :  { %13 = vsyncpa [#allocation4], 0  ;;  %s20_s26 = sshll.u32 %s534_s1, 4  ;;  %s418_s27 = smov [#allocation2]   ;;  %s21_s26 = int_to_ptr.hbm [resolvable:$true] %s20_s26 }
   0x2   :  { %s22_s28 = sshll.u32 %s418_s27, 4  ;;  %s419_s29 = smov 64   ;;  %s23_s28 = int_to_ptr.vmem [resolvable:$true] %s22_s28 }
   0x3   :  { %s420_s30 = smov 4  }
   0x4   :  { %28 = dma.hbm_to_vmem [thread:$0]  %s21_s26, 128, %s23_s28, [#allocation3], %s419_s29, %s419_s29, %s420_s30  }
   0x5   :  { %414 = dma.done.wait [#allocation3], 128  }
   0x6   :  { %415 = vsyncadd [#allocation3], 4294967168  ;;  %v340_v0 = vld [vmem:[#allocation2] sm:$0xff]  ;;  %v45_v2 = vld [vmem:[%s533_s0 + $0x8] sm:$0xff]  ;;  %vm59_vm0 = vcmask 130048   ;;  %vm249_vm1 = vcmask 261120  }
   0x7   :  { %v44_v1 = vld [vmem:[%s533_s0] sm:$0xff]  ;;  %v348_v4 = vld [vmem:[%s536_s3 + $0x38] sm:$0xff]  ;;  %70 = vmatpush.bf16.msra.mxu0 %v340_v0  ;;  %v347_v5 = vld [vmem:[%s536_s3 + $0x30] sm:$0xff]  ;;  %s258_s23 = sshll.u32 %s540_s7, 4  ;;  %s422_s24 = smov 128   ;;  %s259_s23 = int_to_ptr.hbm [resolvable:$true] %s258_s23 }
   0x8   :  { %v46_v3 = vpack.c.bf16 %v45_v2, %v44_v1  ;;  %148 = vmatpush.bf16.msra.mxu1 %v348_v4  ;;  %v346_v6 = vld [vmem:[%s536_s3 + $0x28] sm:$0xff]  ;;  %v345_v7 = vld [vmem:[%s536_s3 + $0x20] sm:$0xff]  ;;  %v344_v8 = vld [vmem:[%s536_s3 + $0x18] sm:$0xff]  ;;  %s423_s25 = smov 8  }
   0x9   :  { %v343_v9 = vld [vmem:[%s536_s3 + $0x10] sm:$0xff]  ;;  %v342_v10 = vld [vmem:[%s536_s3 + $0x8] sm:$0xff]  ;;  %v341_v11 = vld [vmem:[%s536_s3] sm:$0xff] }
   0xa   :  { %275 = vmatmul.msk.bf16.vlgmr.msra.gmra.mxu0 %vm59_vm0, %v46_v3  ;;  %v356_v12 = vld [vmem:[%s538_s5 + $0x38] sm:$0xff]  ;;  %v355_v13 = vld [vmem:[%s538_s5 + $0x30] sm:$0xff]  ;;  %v354_v14 = vld [vmem:[%s538_s5 + $0x28] sm:$0xff] }
   0xb   :  { %233 = vmatpush.bf16.msra.mxu2 %v356_v12  ;;  %v353_v15 = vld [vmem:[%s538_s5 + $0x20] sm:$0xff]  ;;  %v352_v24 = vld [vmem:[%s538_s5 + $0x18] sm:$0xff]  ;;  %v351_v25 = vld [vmem:[%s538_s5 + $0x10] sm:$0xff] }
   0xc   :  { %149 = vmatpush.bf16.msra.mxu1 %v347_v5  ;;  %v363_v17 = vld [vmem:[%s535_s2] ss:$0 sm:$0xff]  ;;  %v350_v26 = vld [vmem:[%s538_s5 + $0x8] sm:$0xff] }
   0xd   :  { %v349_v27 = vld [vmem:[%s538_s5] sm:$0xff]  ;;  %s421_s5 = smov [#allocation5]  }
   0xe   :  { %v364_v29 = vld [vmem:[%s537_s4] ss:$0 sm:$0xff]  ;;  %s256_s21 = sshll.u32 %s421_s5, 4  ;;  %s257_s21 = int_to_ptr.vmem [resolvable:$true] %s256_s21 }
   0xf   :  { %234 = vmatpush.bf16.msra.mxu2 %v355_v13  ;;  %v365_v36 = vld [vmem:[%s539_s6] ss:$0 sm:$0xff] }
  0x10   :  { %150 = vmatpush.bf16.msra.mxu1 %v346_v6 }
  0x13   :  { %235 = vmatpush.bf16.msra.mxu2 %v354_v14 }
  0x14   :  { %151 = vmatpush.bf16.msra.mxu1 %v345_v7 }
  0x17   :  { %236 = vmatpush.bf16.msra.mxu2 %v353_v15 }
  0x18   :  { %152 = vmatpush.bf16.msra.mxu1 %v344_v8 }
  0x1b   :  { %237 = vmatpush.bf16.msra.mxu2 %v352_v24 }
  0x1c   :  { %153 = vmatpush.bf16.msra.mxu1 %v343_v9 }
  0x1f   :  { %238 = vmatpush.bf16.msra.mxu2 %v351_v25 }
  0x20   :  { %154 = vmatpush.bf16.msra.mxu1 %v342_v10 }
  0x23   :  { %239 = vmatpush.bf16.msra.mxu2 %v350_v26 }
  0x24   :  { %155 = vmatpush.bf16.msra.mxu1 %v341_v11 }
  0x27   :  { %240 = vmatpush.bf16.msra.mxu2 %v349_v27 }
  0x87   :  { %v72_v16 = vpop.f32.mrf.mxu0 }
  0x88   :  { %v73_v18 = vadd.f32 %v363_v17, %v72_v16 }
  0x8a   :  { %v77_v21 = vmax.f32 %v73_v18, 0.0 }
  0x8f   :  { %v74_v19 = vpop.f32.mrf.mxu0 }
  0x90   :  { %v75_v20 = vadd.f32 %v363_v17, %v74_v19 }
  0x92   :  { %v78_v22 = vmax.f32 %v75_v20, 0.0 }
  0x94   :  { %v79_v23 = vpack.c.bf16 %v78_v22, %v77_v21 }
  0x96   :  { %156 = vmatmul.bf16.vlgmr.msra.gmra.mxu1 %v79_v23 }
 0x113   :  { %v157_v28 = vpop.f32.mrf.mxu1 }
 0x114   :  { %v158_v30 = vadd.f32 %v364_v29, %v157_v28 }
 0x116   :  { %v162_v33 = vmax.f32 %v158_v30, 0.0 }
 0x11b   :  { %v159_v31 = vpop.f32.mrf.mxu1 }
 0x11c   :  { %v160_v32 = vadd.f32 %v364_v29, %v159_v31 }
 0x11e   :  { %v163_v34 = vmax.f32 %v160_v32, 0.0 }
 0x120   :  { %v164_v35 = vpack.c.bf16 %v163_v34, %v162_v33 }
 0x122   :  { %241 = vmatmul.bf16.vlgmr.msra.gmra.mxu2 %v164_v35 }
 0x1a5   :  { %v242_v37 = vpop.f32.mrf.mxu2 }
 0x1a6   :  { %v243_v38 = vadd.f32 %v365_v36, %v242_v37 }
 0x1a8   :  { %v247_v39 = vmax.f32 %v243_v38, 0.0 }
 0x1aa   :  { %250 = vst.msk [vmem:[#allocation5] sm:$0xff] %vm249_vm1, %v247_v39 }
 0x1ad   :  { %v244_v40 = vpop.f32.mrf.mxu2 }
 0x1ae   :  { %v245_v41 = vadd.f32 %v365_v36, %v244_v40 }
 0x1b0   :  { %v248_v42 = vmax.f32 %v245_v41, 0.0 }
 0x1b2   :  { %251 = vst.msk [vmem:[#allocation5 + $0x8] sm:$0xff] %vm249_vm1, %v248_v42 }
 0x1b3   :  { %264 = dma.vmem_to_hbm [thread:$0]  %s257_s21, 256, %s259_s23, [#allocation4], %s422_s24, %s422_s24, %s423_s25  }
 0x1b4   :  { %416 = dma.done.wait [#allocation4], 256  }
 0x1b5   :  { %417 = vsyncadd [#allocation4], 4294967040 }
 0x1b6   :  { %269 = vsyncpa [#allocation3], 1 }
 0x1b7   :  { %270 = vsyncpa [#allocation4], 1 }

// kernel: tpu_custom_call.1
= control target key start
LH: loop header
LB: loop body
LE: loop exit
PB: predicated region body
PF: predicated region fallthrough
CT: control target
= control target key end

     0   :  { %12 = vsyncpa [#allocation3], 0  ;;  %s533_s0 = inlined_call_operand.vmem [shape: f32[16,16], index: 0, kind: input, shape index: {}]   ;;  %s534_s1 = inlined_call_operand.hbm [shape: bf16[16,128], index: 1, kind: input, shape index: {}]   ;;  %s535_s2 = inlined_call_operand.vmem [shape: f32[1,128], index: 2, kind: input, shape index: {}]   ;;  %s536_s3 = inlined_call_operand.vmem [shape: bf16[128,128], index: 3, kind: input, shape index: {}]   ;;  %s537_s4 = inlined_call_operand.vmem [shape: f32[1,128], index: 4, kind: input, shape index: {}]   ;;  %s538_s5 = inlined_call_operand.vmem [shape: bf16[128,32], index: 5, kind: input, shape index: {}]   ;;  %s539_s6 = inlined_call_operand.vmem [shape: f32[1,32], index: 6, kind: input, shape index: {}]   ;;  %s540_s7 = inlined_call_operand.hbm [shape: f32[16,32], index: 7, kind: output, shape index: {}]  }
   0x1   :  { %13 = vsyncpa [#allocation4], 0  ;;  %s20_s26 = sshll.u32 %s534_s1, 4  ;;  %s418_s27 = smov [#allocation2]   ;;  %s21_s26 = int_to_ptr.hbm [resolvable:$true] %s20_s26 }
   0x2   :  { %s22_s28 = sshll.u32 %s418_s27, 4  ;;  %s419_s29 = smov 64   ;;  %s23_s28 = int_to_ptr.vmem [resolvable:$true] %s22_s28 }
   0x3   :  { %s420_s30 = smov 4  }
   0x4   :  { %28 = dma.hbm_to_vmem [thread:$0]  %s21_s26, 128, %s23_s28, [#allocation3], %s419_s29, %s419_s29, %s420_s30  }
   0x5   :  { %414 = dma.done.wait [#allocation3], 128  }
   0x6   :  { %415 = vsyncadd [#allocation3], 4294967168  ;;  %v340_v0 = vld [vmem:[#allocation2] sm:$0xff]  ;;  %v45_v2 = vld [vmem:[%s533_s0 + $0x8] sm:$0xff]  ;;  %vm59_vm0 = vcmask 130048   ;;  %vm249_vm1 = vcmask 261120  }
   0x7   :  { %v44_v1 = vld [vmem:[%s533_s0] sm:$0xff]  ;;  %v348_v4 = vld [vmem:[%s536_s3 + $0x38] sm:$0xff]  ;;  %70 = vmatpush.bf16.msra.mxu0 %v340_v0  ;;  %v347_v5 = vld [vmem:[%s536_s3 + $0x30] sm:$0xff]  ;;  %s258_s23 = sshll.u32 %s540_s7, 4  ;;  %s422_s24 = smov 128   ;;  %s259_s23 = int_to_ptr.hbm [resolvable:$true] %s258_s23 }
   0x8   :  { %v46_v3 = vpack.c.bf16 %v45_v2, %v44_v1  ;;  %148 = vmatpush.bf16.msra.mxu1 %v348_v4  ;;  %v346_v6 = vld [vmem:[%s536_s3 + $0x28] sm:$0xff]  ;;  %v345_v7 = vld [vmem:[%s536_s3 + $0x20] sm:$0xff]  ;;  %v344_v8 = vld [vmem:[%s536_s3 + $0x18] sm:$0xff]  ;;  %s423_s25 = smov 8  }
   0x9   :  { %v343_v9 = vld [vmem:[%s536_s3 + $0x10] sm:$0xff]  ;;  %v342_v10 = vld [vmem:[%s536_s3 + $0x8] sm:$0xff]  ;;  %v341_v11 = vld [vmem:[%s536_s3] sm:$0xff] }
   0xa   :  { %275 = vmatmul.msk.bf16.vlgmr.msra.gmra.mxu0 %vm59_vm0, %v46_v3  ;;  %v356_v12 = vld [vmem:[%s538_s5 + $0x38] sm:$0xff]  ;;  %v355_v13 = vld [vmem:[%s538_s5 + $0x30] sm:$0xff]  ;;  %v354_v14 = vld [vmem:[%s538_s5 + $0x28] sm:$0xff] }
   0xb   :  { %233 = vmatpush.bf16.msra.mxu2 %v356_v12  ;;  %v353_v15 = vld [vmem:[%s538_s5 + $0x20] sm:$0xff]  ;;  %v352_v24 = vld [vmem:[%s538_s5 + $0x18] sm:$0xff]  ;;  %v351_v25 = vld [vmem:[%s538_s5 + $0x10] sm:$0xff] }
   0xc   :  { %149 = vmatpush.bf16.msra.mxu1 %v347_v5  ;;  %v363_v17 = vld [vmem:[%s535_s2] ss:$0 sm:$0xff]  ;;  %v350_v26 = vld [vmem:[%s538_s5 + $0x8] sm:$0xff] }
   0xd   :  { %v349_v27 = vld [vmem:[%s538_s5] sm:$0xff]  ;;  %s421_s5 = smov [#allocation5]  }
   0xe   :  { %v364_v29 = vld [vmem:[%s537_s4] ss:$0 sm:$0xff]  ;;  %s256_s21 = sshll.u32 %s421_s5, 4  ;;  %s257_s21 = int_to_ptr.vmem [resolvable:$true] %s256_s21 }
   0xf   :  { %234 = vmatpush.bf16.msra.mxu2 %v355_v13  ;;  %v365_v36 = vld [vmem:[%s539_s6] ss:$0 sm:$0xff] }
  0x10   :  { %150 = vmatpush.bf16.msra.mxu1 %v346_v6 }
  0x13   :  { %235 = vmatpush.bf16.msra.mxu2 %v354_v14 }
  0x14   :  { %151 = vmatpush.bf16.msra.mxu1 %v345_v7 }
  0x17   :  { %236 = vmatpush.bf16.msra.mxu2 %v353_v15 }
  0x18   :  { %152 = vmatpush.bf16.msra.mxu1 %v344_v8 }
  0x1b   :  { %237 = vmatpush.bf16.msra.mxu2 %v352_v24 }
  0x1c   :  { %153 = vmatpush.bf16.msra.mxu1 %v343_v9 }
  0x1f   :  { %238 = vmatpush.bf16.msra.mxu2 %v351_v25 }
  0x20   :  { %154 = vmatpush.bf16.msra.mxu1 %v342_v10 }
  0x23   :  { %239 = vmatpush.bf16.msra.mxu2 %v350_v26 }
  0x24   :  { %155 = vmatpush.bf16.msra.mxu1 %v341_v11 }
  0x27   :  { %240 = vmatpush.bf16.msra.mxu2 %v349_v27 }
  0x87   :  { %v72_v16 = vpop.f32.mrf.mxu0 }
  0x88   :  { %v73_v18 = vadd.f32 %v363_v17, %v72_v16 }
  0x8a   :  { %v77_v21 = vmax.f32 %v73_v18, 0.0 }
  0x8f   :  { %v74_v19 = vpop.f32.mrf.mxu0 }
  0x90   :  { %v75_v20 = vadd.f32 %v363_v17, %v74_v19 }
  0x92   :  { %v78_v22 = vmax.f32 %v75_v20, 0.0 }
  0x94   :  { %v79_v23 = vpack.c.bf16 %v78_v22, %v77_v21 }
  0x96   :  { %156 = vmatmul.bf16.vlgmr.msra.gmra.mxu1 %v79_v23 }
 0x113   :  { %v157_v28 = vpop.f32.mrf.mxu1 }
 0x114   :  { %v158_v30 = vadd.f32 %v364_v29, %v157_v28 }
 0x116   :  { %v162_v33 = vmax.f32 %v158_v30, 0.0 }
 0x11b   :  { %v159_v31 = vpop.f32.mrf.mxu1 }
 0x11c   :  { %v160_v32 = vadd.f32 %v364_v29, %v159_v31 }
 0x11e   :  { %v163_v34 = vmax.f32 %v160_v32, 0.0 }
 0x120   :  { %v164_v35 = vpack.c.bf16 %v163_v34, %v162_v33 }
 0x122   :  { %241 = vmatmul.bf16.vlgmr.msra.gmra.mxu2 %v164_v35 }
 0x1a5   :  { %v242_v37 = vpop.f32.mrf.mxu2 }
 0x1a6   :  { %v243_v38 = vadd.f32 %v365_v36, %v242_v37 }
 0x1a8   :  { %v247_v39 = vmax.f32 %v243_v38, 0.0 }
 0x1aa   :  { %250 = vst.msk [vmem:[#allocation5] sm:$0xff] %vm249_vm1, %v247_v39 }
 0x1ad   :  { %v244_v40 = vpop.f32.mrf.mxu2 }
 0x1ae   :  { %v245_v41 = vadd.f32 %v365_v36, %v244_v40 }
 0x1b0   :  { %v248_v42 = vmax.f32 %v245_v41, 0.0 }
 0x1b2   :  { %251 = vst.msk [vmem:[#allocation5 + $0x8] sm:$0xff] %vm249_vm1, %v248_v42 }
 0x1b3   :  { %264 = dma.vmem_to_hbm [thread:$0]  %s257_s21, 256, %s259_s23, [#allocation4], %s422_s24, %s422_s24, %s423_s25  }
 0x1b4   :  { %416 = dma.done.wait [#allocation4], 256  }
 0x1b5   :  { %417 = vsyncadd [#allocation4], 4294967040 }
 0x1b6   :  { %269 = vsyncpa [#allocation3], 1 }
 0x1b7   :  { %270 = vsyncpa [#allocation4], 1 }

</bundles_post_ra>
